<compile_context>
chip_gen: v6e
topology: v6e:2x2x1
jax: 0.10.0
libtpu: 0.0.40
codegen_flags: <defaults>
</compile_context>

<pallas_src>
import functools
import math
import random

import jax
import jax.numpy as jnp
from jax import lax
from jax.experimental import pallas as pl
from jax.experimental.pallas import tpu as pltpu


_TARGET_TILE_BYTES = 4 * 1024 * 1024    # per VMEM data tile (v7x-friendly)
_VMEM_LIMIT_BYTES = 32 * 1024 * 1024    # scoped limit; safe on v5e/v6e/v7x
_MAX_ALIGN_ROWS = 1024                  # give up on flattened path if mask period is huge


def _lcm(a, b):
    return a * b // math.gcd(a, b)


def _sublane_multiple(itemsize):
    # packed sub-32-bit dtypes occupy sublanes in pairs/quads
    return {4: 8, 2: 16, 1: 32}.get(itemsize, 8)


def _largest_aligned_divisor(total, align, cap):
    """Largest divisor of `total` that is a multiple of `align` and <= cap; else total."""
    if align <= 0 or total % align != 0:
        return total
    best = None
    d = 1
    while d * d <= total:
        if total % d == 0:
            for c in (d, total // d):
                if c % align == 0 and c <= cap and (best is None or c > best):
                    best = c
        d += 1
    return best if best is not None else total


# ----------------------------- Pallas kernels --------------------------------
def _lane_kernel_subbatch(thr_ref, x_ref, mask_ref, o_ref):
    """Sub-batch tiles (large per-batch slabs). Batch dim squeezed.

    thr_ref  : SMEM (1,) int32           -- keep_k * D (flat per-batch threshold)
    x_ref    : VMEM (nsub, mr, 128)      -- flattened token tile
    mask_ref : VMEM (1,    mr, 128)      -- minimal aligned mask period block
    o_ref    : VMEM (nsub, mr, 128)
    """
    nsub, mr, lanes = x_ref.shape
    thr = thr_ref[0]
    tile_elems = nsub * mr * lanes
    tile_start = pl.program_id(1) * tile_elems
    tile_end = tile_start + tile_elems

    @pl.when(tile_end <= thr)                 # fully kept: straight copy
    def _():
        o_ref[...] = x_ref[...]

    @pl.when(tile_start >= thr)               # fully dropped: mask pattern only
    def _():                                  # (x_ref is never read -> DMA elided via clamp)
        o_ref[...] = jnp.broadcast_to(mask_ref[...], (nsub, mr, lanes))

    @pl.when(jnp.logical_and(tile_start < thr, thr < tile_end))   # boundary tile
    def _():
        g = lax.broadcasted_iota(jnp.int32, (nsub, mr, lanes), 0)
        r = lax.broadcasted_iota(jnp.int32, (nsub, mr, lanes), 1)
        c = lax.broadcasted_iota(jnp.int32, (nsub, mr, lanes), 2)
        flat = tile_start + g * (mr * lanes) + r * lanes + c
        o_ref[...] = jnp.where(flat < thr, x_ref[...], mask_ref[...])


def _lane_kernel_batched(thr_ref, x_ref, mask_ref, o_ref):
    """Batch-collapsed tiles (small per-batch slabs): block covers bb whole batch items.

    x_ref/o_ref : VMEM (bb, rows, 128)
    mask_ref    : VMEM (1,  rows, 128)   -- mask pattern for one batch item
    """
    bb, rows, lanes = x_ref.shape
    thr = thr_ref[0]

    @pl.when(thr >= rows * lanes)             # keep everything
    def _():
        o_ref[...] = x_ref[...]

    @pl.when(thr < rows * lanes)
    def _():
        r = lax.broadcasted_iota(jnp.int32, (1, rows, lanes), 1)
        c = lax.broadcasted_iota(jnp.int32, (1, rows, lanes), 2)
        keep = (r * lanes + c) < thr          # per-batch-item element index < keep_k*D
        o_ref[...] = jnp.where(keep, x_ref[...], mask_ref[...])


def _token_kernel(keep_ref, x_ref, mask_ref, o_ref):
    """Fallback (rare): last dim = D directly; used when N*D % 128 != 0 or the
    flattened mask period would be unreasonably large."""
    # TODO(synk): pad D up to a multiple of 128 here for fully lane-dense stores.
    tn, d = x_ref.shape
    keep_k = keep_ref[0]
    tok = pl.program_id(1) * tn + lax.broadcasted_iota(jnp.int32, (tn, d), 0)
    o_ref[...] = jnp.where(tok < keep_k, x_ref[...], mask_ref[...])


# ------------------------------- Wrapper --------------------------------------
def _token_path(x, mask_token, keep_k, target_tile_bytes):
    B, N, D = x.shape
    dtype = x.dtype
    itemsize = jnp.dtype(dtype).itemsize
    sub = _sublane_multiple(itemsize)
    cap = max(sub, target_tile_bytes // max(D * itemsize, 1))
    tn = _largest_aligned_divisor(N, sub, cap)
    keep_arr = jnp.asarray(keep_k, jnp.int32).reshape((1,))
    mask2d = mask_token.reshape(1, D)
    return pl.pallas_call(
        _token_kernel,
        out_shape=jax.ShapeDtypeStruct((B, N, D), dtype),
        grid_spec=pltpu.PrefetchScalarGridSpec(
            num_scalar_prefetch=1,
            grid=(B, N // tn),
            in_specs=[
                pl.BlockSpec((None, tn, D), lambda b, i, kk: (b, i, 0)),
                pl.BlockSpec((1, D), lambda b, i, kk: (0, 0)),
            ],
            out_specs=pl.BlockSpec((None, tn, D), lambda b, i, kk: (b, i, 0)),
        ),
        compiler_params=pltpu.CompilerParams(
            dimension_semantics=("parallel", "parallel"),
            vmem_limit_bytes=_VMEM_LIMIT_BYTES,
        ),
        cost_estimate=pl.CostEstimate(
            flops=B * N * D, transcendentals=0,
            bytes_accessed=2 * B * N * D * itemsize),
    )(keep_arr, x, mask2d)


def _nested_dropout_impl(x, mask_token, keep_k, *, target_tile_bytes):
    B, N, D = x.shape
    dtype = x.dtype
    itemsize = jnp.dtype(dtype).itemsize
    mask_token = mask_token.astype(dtype)
    keep_k = jnp.asarray(keep_k, jnp.int32)
    sub = _sublane_multiple(itemsize)

    lane_ok = (N * D) % 128 == 0
    if lane_ok:
        pr = D // math.gcd(D, 128)           # mask pattern period, in 128-lane rows
        align = _lcm(pr, sub)                # row alignment: period x sublane packing
        lane_ok = align <= _MAX_ALIGN_ROWS
    if not lane_ok:
        return _token_path(x, mask_token, keep_k, target_tile_bytes)

    rows = (N * D) // 128                    # 128-lane rows per batch item
    slab_bytes = rows * 128 * itemsize
    thr = (keep_k * jnp.int32(D)).reshape((1,))
    cost = pl.CostEstimate(flops=B * N * D, transcendentals=0,
                           bytes_accessed=2 * B * N * D * itemsize)

    if slab_bytes >= target_tile_bytes:
        # ---- Path A: sub-batch tiles + dropped-region input-DMA elision ----
        pad = (-rows) % align
        rows_p = rows + pad
        x3 = x.reshape(B, rows, 128)
        if pad:
            x3 = jnp.pad(x3, ((0, 0), (0, pad), (0, 0)))
        nblk = rows_p // align
        x4 = x3.reshape(B, nblk, align, 128)

        cap_rows = max(align, target_tile_bytes // (128 * itemsize))
        nsub = min(max(1, cap_rows // align), nblk)     # align-blocks per tile
        tile_elems = nsub * align * 128
        grid = (B, pl.cdiv(nblk, nsub))

        mask_blk = jnp.tile(mask_token, (align * 128) // D).reshape(1, align, 128)

        def x_index_map(b, rt, thr_ref):
            # Clamp to the boundary tile: fully-dropped tiles map to the same
            # (already-fetched) block and their branch never reads x_ref, so
            # Pallas skips the input DMA for the dropped region.
            return (b, jnp.minimum(rt, thr_ref[0] // tile_elems), 0, 0)

        out = pl.pallas_call(
            _lane_kernel_subbatch,
            out_shape=jax.ShapeDtypeStruct((B, nblk, align, 128), dtype),
            grid_spec=pltpu.PrefetchScalarGridSpec(
                num_scalar_prefetch=1,
                grid=grid,
                in_specs=[
                    pl.BlockSpec((None, nsub, align, 128), x_index_map),
                    pl.BlockSpec((1, align, 128), lambda b, rt, thr_ref: (0, 0, 0)),
                ],
                out_specs=pl.BlockSpec((None, nsub, align, 128),
                                       lambda b, rt, thr_ref: (b, rt, 0, 0)),
            ),
            compiler_params=pltpu.CompilerParams(
                dimension_semantics=("parallel", "parallel"),
                vmem_limit_bytes=_VMEM_LIMIT_BYTES,
            ),
            cost_estimate=cost,
        )(thr, x4, mask_blk)
        out = out.reshape(B, rows_p, 128)
        if pad:
            out = out[:, :rows, :]
        return out.reshape(B, N, D)

    # ---- Path B: batch-collapsed tiles (small per-batch slabs) ----
    x3 = x.reshape(B, rows, 128)
    bb = min(B, max(1, target_tile_bytes // max(slab_bytes, 1)))   # batch items per tile
    grid = (pl.cdiv(B, bb),)
    mask_blk = jnp.tile(mask_token, N).reshape(1, rows, 128)

    out = pl.pallas_call(
        _lane_kernel_batched,
        out_shape=jax.ShapeDtypeStruct((B, rows, 128), dtype),
        grid_spec=pltpu.PrefetchScalarGridSpec(
            num_scalar_prefetch=1,
            grid=grid,
            in_specs=[
                pl.BlockSpec((bb, rows, 128), lambda i, thr_ref: (i, 0, 0)),
                pl.BlockSpec((1, rows, 128), lambda i, thr_ref: (0, 0, 0)),
            ],
            out_specs=pl.BlockSpec((bb, rows, 128), lambda i, thr_ref: (i, 0, 0)),
        ),
        compiler_params=pltpu.CompilerParams(
            dimension_semantics=("parallel",),
            vmem_limit_bytes=_VMEM_LIMIT_BYTES,
        ),
        cost_estimate=cost,
    )(thr, x3, mask_blk)
    return out.reshape(B, N, D)


@functools.partial(jax.jit, static_argnames=("target_tile_bytes",))
def _nested_dropout_jit(x, mask_token, keep_k, *, target_tile_bytes):
    return _nested_dropout_impl(x, mask_token, keep_k,
                                target_tile_bytes=target_tile_bytes)


def nested_dropout_apply(x, mask_token, keep_k, *,
                         target_tile_bytes=_TARGET_TILE_BYTES):
    """Apply nested dropout to one tensor x: [B, N, D] -> [B, N, D]."""
    N = x.shape[1]
    keep_k = int(keep_k)
    if keep_k >= N:                      # nothing dropped: skip the kernel entirely
        return x
    return _nested_dropout_jit(x, mask_token, jnp.int32(keep_k),
                               target_tile_bytes=target_tile_bytes)


# --------------------------- Module-level wrapper ----------------------------
class MaskedNestedDropout:
    """JAX/Pallas port of flextok MaskedNestedDropout (forward only)."""

    def __init__(
        self,
        read_write_key,
        dim,
        eval_keep_k_read_key="eval_keep_k",
        train_keep_k_write_key="train_keep_k",
        size_sampling_mode="uniform",
        param_key=None,
    ):
        self.read_write_key = read_write_key
        self.dim = dim
        self.eval_keep_k_read_key = eval_keep_k_read_key
        self.train_keep_k_write_key = train_keep_k_write_key
        self.size_sampling_mode = size_sampling_mode
        self.training = True
        if param_key is None:
            param_key = jax.random.PRNGKey(0)
        # trunc_normal_(std=0.02): deterministic init in-script.
        self.dropout_mask_token = (
            0.02
            * jax.random.truncated_normal(param_key, -2.0, 2.0, (dim,), jnp.float32)
        )
        self._rng = random.Random(1234)  # deterministic keep_k sampling

    def sample_keep_k(self, N):
        if self.size_sampling_mode == "uniform":
            return self._rng.randint(1, N)
        elif self.size_sampling_mode == "pow2":
            assert (N & (N - 1)) == 0
            choices, p = [], 1
            while p <= N:
                choices.append(p)
                p <<= 1
            return self._rng.choice(choices)
        elif self.size_sampling_mode == "uniform_pow2":
            k = self._rng.randint(1, N)
            return k if (k & (k - 1)) == 0 else 1 << k.bit_length()
        else:
            raise ValueError(
                f"size_sampling_mode {self.size_sampling_mode} is not defined."
            )

    def __call__(self, data_dict):
        if not self.training:
            if self.eval_keep_k_read_key is None:
                return data_dict
            if self.eval_keep_k_read_key not in data_dict:
                return data_dict
            tensors = data_dict[self.read_write_key]
            for i in range(len(tensors)):
                keep_k = data_dict[self.eval_keep_k_read_key][i]
                tensors[i] = nested_dropout_apply(
                    tensors[i], self.dropout_mask_token, keep_k
                )
        else:
            tensors = data_dict[self.read_write_key]
            keep_ks = []
            for i in range(len(tensors)):
                N = tensors[i].shape[1]
                keep_k = self.sample_keep_k(N)
                keep_ks.append(keep_k)
                tensors[i] = nested_dropout_apply(
                    tensors[i], self.dropout_mask_token, keep_k
                )
            data_dict[self.train_keep_k_write_key] = keep_ks
        return data_dict


# ---------------------------------- Test -------------------------------------
def _reference(x, mask_token, keep_k):
    B, N, D = x.shape
    mask = (jnp.arange(N) < keep_k)[None, :, None]
    return jnp.where(mask, x, mask_token[None, None, :].astype(x.dtype))


if __name__ == "__main__":
    key = jax.random.PRNGKey(0)
    k_param, k_x0, k_x1, k_x2, k_x3 = jax.random.split(key, 5)

    B, D = 2, 32
    x0 = jax.random.normal(k_x0, (B, 16, D), jnp.float32)   # N = 16
    x1 = jax.random.normal(k_x1, (B, 8, D), jnp.float32)    # N = 8

    module = MaskedNestedDropout(
        read_write_key="tokens", dim=D, param_key=k_param,
        size_sampling_mode="uniform",
    )
    ok = True

    # Training path (batch-collapsed lane-dense kernel).
    module.training = True
    out_dict = module({"tokens": [x0, x1]})
    outs = [jax.block_until_ready(t) for t in out_dict["tokens"]]
    keep_ks = out_dict["train_keep_k"]
    for x_in, x_out, kk in zip([x0, x1], outs, keep_ks):
        ok = ok and bool(jnp.array_equal(
            x_out, _reference(x_in, module.dropout_mask_token, kk)))

    # Eval path with explicit eval_keep_k (hits the boundary-select branch).
    module.training = False
    eval_dict = module({"tokens": [x0, x1], "eval_keep_k": [4, 2]})
    for x_in, x_out, kk in zip([x0, x1], eval_dict["tokens"], [4, 2]):
        x_out = jax.block_until_ready(x_out)
        ok = ok and bool(jnp.array_equal(
            x_out, _reference(x_in, module.dropout_mask_token, kk)))

    # Sub-batch tiled path (Path A) with the clamped (DMA-eliding) index_map:
    # force it at small shapes by lowering the tile-size target.
    x2 = jax.random.normal(k_x2, (2, 64, D), jnp.float32)   # 2 row-tiles per batch
    for kk in (1, 20, 63):
        y = jax.block_until_ready(nested_dropout_apply(
            x2, module.dropout_mask_token, kk, target_tile_bytes=4096))
        ok = ok and bool(jnp.array_equal(
            y, _reference(x2, module.dropout_mask_token, kk)))

    # Path A with row padding (rows not a multiple of the alignment).
    x3 = jax.random.normal(k_x3, (2, 40, D), jnp.float32)
    y = jax.block_until_ready(nested_dropout_apply(
        x3, module.dropout_mask_token, 7, target_tile_bytes=4096))
    ok = ok and bool(jnp.array_equal(
        y, _reference(x3, module.dropout_mask_token, 7)))

    if ok:
        print("KERNEL_OK")
    else:
        print("MISMATCH")
</pallas_src>

<mosaic_0001>
module attributes {stable_mosaic.version = 11 : i64} {
  func.func @_lane_kernel_batched(%arg0: i32, %arg1: memref<1xi32, #tpu.memory_space<smem>>, %arg2: memref<2x4x128xf32, #tpu.memory_space<vmem>>, %arg3: memref<1x4x128xf32, #tpu.memory_space<vmem>>, %arg4: memref<2x4x128xf32, #tpu.memory_space<vmem>>) attributes {dimension_semantics = [#tpu.dimension_semantics<parallel>], iteration_bounds = array<i64: 1>, scalar_prefetch = 1 : i64, scratch_operands = 0 : i64, tpu.core_type = #tpu.core_type<tc>, window_params = [{transform_indices = @transform_0, window_bounds = array<i64: 2, 4, 128>}, {pipeline_mode = #tpu.pipeline_mode<synchronous>, transform_indices = @transform_1, window_bounds = array<i64: 1, 4, 128>}, {transform_indices = @transform_2, window_bounds = array<i64: 2, 4, 128>}]} {
    %c0 = arith.constant 0 : index
    %0 = memref.load %arg1[%c0] : memref<1xi32, #tpu.memory_space<smem>>
    %c512_i32 = arith.constant 512 : i32
    %1 = arith.cmpi sge, %0, %c512_i32 : i32
    %2 = arith.extui %1 : i1 to i32
    %c0_i32 = arith.constant 0 : i32
    %3 = arith.cmpi ne, %2, %c0_i32 : i32
    scf.if %3 {
      %c0_2 = arith.constant 0 : index
      %c0_3 = arith.constant 0 : index
      %c0_4 = arith.constant 0 : index
      %7 = vector.load %arg2[%c0_2, %c0_3, %c0_4] : memref<2x4x128xf32, #tpu.memory_space<vmem>>, vector<2x4x128xf32>
      %c0_5 = arith.constant 0 : index
      %c0_6 = arith.constant 0 : index
      %c0_7 = arith.constant 0 : index
      %8 = vector.load %arg4[%c0_5, %c0_6, %c0_7] : memref<2x4x128xf32, #tpu.memory_space<vmem>>, vector<2x4x128xf32>
      tpu.vector_store %arg4[%c0_5, %c0_6, %c0_7], %7 {strides = array<i32>} : memref<2x4x128xf32, #tpu.memory_space<vmem>>, vector<2x4x128xf32>,
    } else {
    }
    %c512_i32_0 = arith.constant 512 : i32
    %4 = arith.cmpi slt, %0, %c512_i32_0 : i32
    %5 = arith.extui %4 : i1 to i32
    %c0_i32_1 = arith.constant 0 : i32
    %6 = arith.cmpi ne, %5, %c0_i32_1 : i32
    scf.if %6 {
      %7 = tpu.iota {dimensions = array<i32: 1>} : vector<1x4x128xi32>
      %8 = tpu.iota {dimensions = array<i32: 2>} : vector<1x4x128xi32>
      %c128_i32 = arith.constant 128 : i32
      %9 = vector.broadcast %c128_i32 : i32 to vector<1x4x128xi32>
      %10 = arith.muli %7, %9 : vector<1x4x128xi32>
      %11 = arith.addi %10, %8 : vector<1x4x128xi32>
      %12 = vector.broadcast %0 : i32 to vector<1x4x128xi32>
      %13 = arith.cmpi slt, %11, %12 : vector<1x4x128xi32>
      %c0_2 = arith.constant 0 : index
      %c0_3 = arith.constant 0 : index
      %c0_4 = arith.constant 0 : index
      %14 = vector.load %arg2[%c0_2, %c0_3, %c0_4] : memref<2x4x128xf32, #tpu.memory_space<vmem>>, vector<2x4x128xf32>
      %c0_5 = arith.constant 0 : index
      %c0_6 = arith.constant 0 : index
      %c0_7 = arith.constant 0 : index
      %15 = vector.load %arg3[%c0_5, %c0_6, %c0_7] : memref<1x4x128xf32, #tpu.memory_space<vmem>>, vector<1x4x128xf32>
      %16 = vector.shape_cast %13 : vector<1x4x128xi1> to vector<1x4x128xi1>
      %17 = vector.broadcast %16 : vector<1x4x128xi1> to vector<2x4x128xi1>
      %18 = vector.shape_cast %15 : vector<1x4x128xf32> to vector<1x4x128xf32>
      %19 = vector.broadcast %18 : vector<1x4x128xf32> to vector<2x4x128xf32>
      %20 = arith.select %17, %14, %19 : vector<2x4x128xi1>, vector<2x4x128xf32>
      %c0_8 = arith.constant 0 : index
      %c0_9 = arith.constant 0 : index
      %c0_10 = arith.constant 0 : index
      %21 = vector.load %arg4[%c0_8, %c0_9, %c0_10] : memref<2x4x128xf32, #tpu.memory_space<vmem>>, vector<2x4x128xf32>
      tpu.vector_store %arg4[%c0_8, %c0_9, %c0_10], %20 {strides = array<i32>} : memref<2x4x128xf32, #tpu.memory_space<vmem>>, vector<2x4x128xf32>,
    } else {
    }
    return
  }
  func.func @transform_0(%arg0: i32, %arg1: memref<1xi32, #tpu.memory_space<smem>>) -> (i32, i32, i32) {
    %c0_i32 = arith.constant 0 : i32
    %c0_i32_0 = arith.constant 0 : i32
    %c0_i32_1 = arith.constant 0 : i32
    return %arg0, %c0_i32, %c0_i32_0 : i32, i32, i32
  }
  func.func @transform_1(%arg0: i32, %arg1: memref<1xi32, #tpu.memory_space<smem>>) -> (i32, i32, i32) {
    %c0_i32 = arith.constant 0 : i32
    %c0_i32_0 = arith.constant 0 : i32
    %c0_i32_1 = arith.constant 0 : i32
    %c0_i32_2 = arith.constant 0 : i32
    return %c0_i32, %c0_i32_0, %c0_i32_1 : i32, i32, i32
  }
  func.func @transform_2(%arg0: i32, %arg1: memref<1xi32, #tpu.memory_space<smem>>) -> (i32, i32, i32) {
    %c0_i32 = arith.constant 0 : i32
    %c0_i32_0 = arith.constant 0 : i32
    %c0_i32_1 = arith.constant 0 : i32
    return %arg0, %c0_i32, %c0_i32_0 : i32, i32, i32
  }
}

</mosaic_0001>

<bundles_post_ra>
// kernel: _nested_dropout_jit.1
= control target key start
LH: loop header
LB: loop body
LE: loop exit
PB: predicated region body
PF: predicated region fallthrough
CT: control target
= control target key end

     0   :  { %s99_s0 = inlined_call_operand.<no memory space> [shape: s32[1], index: 0, kind: input, shape index: {}]   ;;  %s100_s1 = inlined_call_operand.vmem [shape: f32[2,4,128], index: 1, kind: input, shape index: {}]   ;;  %s101_s2 = inlined_call_operand.vmem [shape: f32[1,4,128], index: 2, kind: input, shape index: {}]   ;;  %s102_s3 = inlined_call_operand.vmem [shape: f32[2,4,128], index: 3, kind: output, shape index: {}]  }
   0x1   :  { %p47_p0 = scmp.lt.s32.totalorder %s99_s0, 512 }
   0x3   :  { %17 = sbr.rel (%p47_p0) target bundleno = 10 (0xa), region = 13 }
   0x8   :  { %v18_v0 = vld [vmem:[%s100_s1] sm:$0xff]  }
   0x9   :  { %20 = vst [vmem:[%s102_s3] sm:$0xff] %v18_v0  }
   0xa PF:  { %p48_p1 = scmp.ge.s32.totalorder %s99_s0, 512 }
   0xc   :  { %25 = sbr.rel (%p48_p1) target bundleno = 28 (0x1c), region = 17 }
  0x11   :  { %v26_v1 = vlaneseq  ;;  %v32_v5 = vstv %s99_s0  ;;  %v34_v7 = vld [vmem:[%s100_s1] sm:$0xf]  ;;  %v35_v9 = vld [vmem:[%s100_s1 + $0x4] sm:$0xf] }
  0x12   :  { %v36_v8 = vld [vmem:[%s101_s2] sm:$0xf] }
  0x13   :  { %v27_v2 = vshrl.u32 %v26_v1, 7  ;;  %v29_v3 = vand.u32 127, %v26_v1 }
  0x15   :  { %v30_v4 = vmul.u32 128, %v27_v2 }
  0x17   :  { %v31_v6 = vadd.s32 %v30_v4, %v29_v3 }
  0x19   :  { %vm33_vm0 = vcmp.lt.s32.totalorder %v31_v6, %v32_v5 }
  0x1a   :  { %v39_v10 = vsel %vm33_vm0, %v34_v7, %v36_v8  ;;  %v40_v11 = vsel %vm33_vm0, %v35_v9, %v36_v8 }
  0x1b   :  { %41 = vst [vmem:[%s102_s3] sm:$0xf] %v39_v10  ;;  %42 = vst [vmem:[%s102_s3 + $0x4] sm:$0xf] %v40_v11 }
  0x1c PF:  {}

</bundles_post_ra>
